<compile_context>
chip_gen: v5e
topology: v5e:2x2
jax: 0.10.0
libtpu: 0.0.40
codegen_flags: <defaults>
</compile_context>

<pallas_src>
import functools

import jax
import jax.numpy as jnp
from jax import lax
from jax.experimental import pallas as pl
from jax.experimental.pallas import tpu as pltpu  # noqa: F401  (TPU backend params if needed)


def _hermitian_kernel(x_ref, out_ref, *, q, rows, lanes):
    # x_ref  : (2*rows, lanes) f32.  Rows [0, rows)      = base,      flattened d*q*q.
    #                                Rows [rows, 2*rows) = base^T per slice, same flattening.
    # out_ref: (2*rows, lanes) f32.  Rows [0, rows) = Re(out), rows [rows, 2*rows) = Im(out).
    b = x_ref[:rows, :]
    bt = x_ref[rows:, :]

    # Flat element index n = d*q*q + i*q + j over the dense (rows, lanes) tile.
    sub = lax.broadcasted_iota(jnp.int32, (rows, lanes), 0)
    lane = lax.broadcasted_iota(jnp.int32, (rows, lanes), 1)
    n = sub * lanes + lane

    if q & (q - 1) == 0:
        # Power-of-two q: shift/AND only (stays on the VPU integer path).
        shift = q.bit_length() - 1
        row = (n >> shift) & (q - 1)
        col = n & (q - 1)
    else:
        row = (n // q) % q
        col = n % q

    lower = row > col
    upper = row < col

    # Re(out): lower triangle takes the transposed element, upper/diag take the element.
    re = jnp.where(lower, bt, b)
    # Im(out): strictly lower -> +b_ij, strictly upper -> -b_ji, diagonal -> 0.
    im = jnp.where(lower, b, jnp.where(upper, -bt, jnp.zeros_like(b)))

    # One contiguous, fully lane/sublane-dense store.
    out_ref[...] = jnp.concatenate([re, im], axis=0)


@jax.jit
def hermitian_layer_forward(hermitian_base):
    """hermitian_base: (input_dim, Q, Q) float32 parameter.

    Returns the complex64 Hermitian stack of shape (input_dim, Q, Q), matching the
    PyTorch HermitianLayer.forward().
    """
    d, q, q2 = hermitian_base.shape
    assert q == q2
    qq = q * q
    total = d * qq

    # Sublane-dense flattening: prefer 128-lane slabs so vregs are fully populated.
    lanes = 128 if total % 128 == 0 else qq
    rows = total // lanes

    b_flat = hermitian_base.reshape(rows, lanes)
    bt_flat = jnp.swapaxes(hermitian_base, -1, -2).reshape(rows, lanes)
    # One stacked operand -> a single input BlockSpec / DMA for the kernel (the
    # transpose + concat fuse into one XLA producer fusion).
    stacked = jnp.concatenate([b_flat, bt_flat], axis=0)  # (2*rows, lanes)

    out = pl.pallas_call(
        functools.partial(_hermitian_kernel, q=q, rows=rows, lanes=lanes),
        out_shape=jax.ShapeDtypeStruct((2 * rows, lanes), jnp.float32),
        # No grid: a single invocation processes the whole (tiny) problem.
        in_specs=[pl.BlockSpec((2 * rows, lanes), lambda: (0, 0))],
        out_specs=pl.BlockSpec((2 * rows, lanes), lambda: (0, 0)),
    )(stacked)

    # Planar Re/Im come out of the kernel; assemble complex64 for API parity with the
    # PyTorch module (a downstream Pallas decoder kernel would consume the planar slab
    # directly and skip this pass entirely).
    re = out[:rows].reshape(d, q, q)
    im = out[rows:].reshape(d, q, q)
    return lax.complex(re, im)


if __name__ == "__main__":
    quantum_dim = 16
    input_dim = 4

    key = jax.random.PRNGKey(0)
    # nn.Parameter(torch.randn(input_dim, quantum_dim, quantum_dim)) -> standard normal
    hermitian_base = jax.random.normal(
        key, (input_dim, quantum_dim, quantum_dim), dtype=jnp.float32)

    out = hermitian_layer_forward(hermitian_base)
    out = jax.block_until_ready(out)

    assert out.shape == (input_dim, quantum_dim, quantum_dim)
    assert out.dtype == jnp.complex64

    # Result must be Hermitian per input_dim slice.
    herm_err = jnp.max(jnp.abs(out - jnp.conj(jnp.swapaxes(out, -1, -2))))
    assert float(herm_err) < 1e-5

    # Reference check: replicate the PyTorch constant_matrix construction exactly.
    eye = jnp.eye(quantum_dim, dtype=jnp.float32)
    ones = jnp.ones((quantum_dim, quantum_dim), dtype=jnp.float32)
    const_c = (0.5 * eye + jnp.triu(ones, k=1)
               + 1j * jnp.tril(ones, k=-1)).astype(jnp.complex64)
    structured = const_c[None, :, :] * hermitian_base.astype(jnp.complex64)
    ref = structured + jnp.conj(jnp.swapaxes(structured, -1, -2))
    assert float(jnp.max(jnp.abs(out - ref))) < 1e-5

    print("KERNEL_OK")
</pallas_src>

<mosaic_0001>
module attributes {stable_mosaic.version = 11 : i64} {
  func.func @_hermitian_kernel(%arg0: memref<16x128xf32, #tpu.memory_space<vmem>>, %arg1: memref<16x128xf32, #tpu.memory_space<vmem>>) attributes {dimension_semantics = [], scalar_prefetch = 0 : i64, scratch_operands = 0 : i64, tpu.core_type = #tpu.core_type<tc>} {
    %c0 = arith.constant 0 : index
    %c0_0 = arith.constant 0 : index
    %0 = vector.load %arg0[%c0, %c0_0] : memref<16x128xf32, #tpu.memory_space<vmem>>, vector<8x128xf32>
    %c8 = arith.constant 8 : index
    %c0_1 = arith.constant 0 : index
    %1 = vector.load %arg0[%c8, %c0_1] : memref<16x128xf32, #tpu.memory_space<vmem>>, vector<8x128xf32>
    %2 = tpu.iota {dimensions = array<i32: 0>} : vector<8x128xi32>
    %3 = tpu.iota {dimensions = array<i32: 1>} : vector<8x128xi32>
    %c128_i32 = arith.constant 128 : i32
    %4 = vector.broadcast %c128_i32 : i32 to vector<8x128xi32>
    %5 = arith.muli %2, %4 : vector<8x128xi32>
    %6 = arith.addi %5, %3 : vector<8x128xi32>
    %c4_i32 = arith.constant 4 : i32
    %7 = vector.broadcast %c4_i32 : i32 to vector<8x128xi32>
    %8 = arith.shrsi %6, %7 : vector<8x128xi32>
    %c15_i32 = arith.constant 15 : i32
    %9 = vector.broadcast %c15_i32 : i32 to vector<8x128xi32>
    %10 = arith.andi %8, %9 : vector<8x128xi32>
    %c15_i32_2 = arith.constant 15 : i32
    %11 = vector.broadcast %c15_i32_2 : i32 to vector<8x128xi32>
    %12 = arith.andi %6, %11 : vector<8x128xi32>
    %13 = arith.cmpi sgt, %10, %12 : vector<8x128xi32>
    %14 = arith.cmpi slt, %10, %12 : vector<8x128xi32>
    %15 = arith.select %13, %1, %0 : vector<8x128xi1>, vector<8x128xf32>
    %cst = arith.constant 0.000000e+00 : f32
    %16 = vector.broadcast %cst : f32 to vector<8x128xf32>
    %17 = arith.subf %16, %1 : vector<8x128xf32>
    %cst_3 = arith.constant 0.000000e+00 : f32
    %18 = vector.broadcast %cst_3 : f32 to vector<8x128xf32>
    %19 = arith.select %14, %17, %18 : vector<8x128xi1>, vector<8x128xf32>
    %20 = arith.select %13, %0, %19 : vector<8x128xi1>, vector<8x128xf32>
    %21 = tpu.concatenate %15, %20 in 0 : vector<8x128xf32>, vector<8x128xf32> -> vector<16x128xf32>
    %c0_4 = arith.constant 0 : index
    %c0_5 = arith.constant 0 : index
    %22 = vector.load %arg1[%c0_4, %c0_5] : memref<16x128xf32, #tpu.memory_space<vmem>>, vector<16x128xf32>
    tpu.vector_store %arg1[%c0_4, %c0_5], %21 {strides = array<i32>} : memref<16x128xf32, #tpu.memory_space<vmem>>, vector<16x128xf32>,
    return
  }
}

</mosaic_0001>

<bundles_post_ra>
// kernel: custom-call
= control target key start
LH: loop header
LB: loop body
LE: loop exit
PB: predicated region body
PF: predicated region fallthrough
CT: control target
= control target key end

     0   :  { %s105_s0 = inlined_call_operand.vmem [shape: f32[4,16,16], index: 0, kind: input, shape index: {}]   ;;  %s106_s1 = inlined_call_operand.vmem [shape: f32[4,16,16], index: 1, kind: input, shape index: {}]   ;;  %s107_s2 = inlined_call_operand.hbm [shape: c64[4,16,16], index: 2, kind: output, shape index: {}]  }
   0x1   :  { %s3_s11 = scalar_lea.hbm %s107_s2, 64 }
   0x2   :  { %4 = vsyncpa [#allocation0], 0  ;;  %s6_s14 = sshll.u32 %s105_s0, 4  ;;  %s8_s17 = sshll.u32 %s107_s2, 4  ;;  %s7_s14 = int_to_ptr.vmem [resolvable:$true] %s6_s14  ;;  %s9_s17 = int_to_ptr.hbm [resolvable:$true] %s8_s17 }
   0x3   :  { %11 = dma.vmem_to_hbm [thread:$0]  %s7_s14, 1024, %s9_s17, [#allocation0] }
   0x4   :  { %74 = dma.done.wait [#allocation0], 1024  }
   0x5   :  { %75 = vsyncadd [#allocation0], 4294966272 }
   0x6   :  { %14 = vsyncpa [#allocation0], 1 }
   0x7   :  { %15 = vsyncpa [#allocation1], 0  ;;  %s17_s20 = sshll.u32 %s106_s1, 4  ;;  %s19_s21 = sshll.u32 %s3_s11, 4  ;;  %s18_s20 = int_to_ptr.vmem [resolvable:$true] %s17_s20  ;;  %s20_s21 = int_to_ptr.hbm [resolvable:$true] %s19_s21 }
   0x8   :  { %22 = dma.vmem_to_hbm [thread:$0]  %s18_s20, 1024, %s20_s21, [#allocation1] }
   0x9   :  { %76 = dma.done.wait [#allocation1], 1024  }
   0xa   :  { %77 = vsyncadd [#allocation1], 4294966272 }
   0xb   :  { %25 = vsyncpa [#allocation1], 1 }

// kernel: hermitian_layer_forward.1
= control target key start
LH: loop header
LB: loop body
LE: loop exit
PB: predicated region body
PF: predicated region fallthrough
CT: control target
= control target key end

     0   :  { %v10_v0 = vlaneseq  ;;  %s53_s0 = inlined_call_operand.vmem [shape: f32[16,128], index: 0, kind: input, shape index: {}]   ;;  %s54_s1 = inlined_call_operand.vmem [shape: f32[16,128], index: 1, kind: output, shape index: {}]  }
   0x1   :  { %v9_v4 = vld [vmem:[%s53_s0 + $0x8] sm:$0xff]  ;;  %v8_v9 = vld [vmem:[%s53_s0] sm:$0xff] }
   0x2   :  { %v11_v1 = vshrl.u32 %v10_v0, 7  ;;  %v13_v2 = vand.u32 127, %v10_v0  ;;  %v22_v8 = vsub.f32 0.0, %v9_v4 }
   0x4   :  { %v14_v3 = vmul.u32 128, %v11_v1 }
   0x6   :  { %v15_v5 = vadd.s32 %v14_v3, %v13_v2 }
   0x8   :  { %v16_v6 = vshra.s32 %v15_v5, 4  ;;  %v18_v7 = vand.u32 15, %v15_v5 }
   0xa   :  { %v17_v10 = vand.u32 15, %v16_v6 }
   0xc   :  { %vm19_vm0 = vcmp.gt.s32.totalorder %v17_v10, %v18_v7  ;;  %vm20_vm1 = vcmp.lt.s32.totalorder %v17_v10, %v18_v7 }
   0xd   :  { %v21_v11 = vsel %vm19_vm0, %v9_v4, %v8_v9  ;;  %v23_v12 = vsel %vm20_vm1, %v22_v8, 0.0 }
   0xe   :  { %25 = vst [vmem:[%s54_s1] sm:$0xff] %v21_v11  ;;  %v24_v13 = vsel %vm19_vm0, %v8_v9, %v23_v12 }
   0xf   :  { %26 = vst [vmem:[%s54_s1 + $0x8] sm:$0xff] %v24_v13 }

</bundles_post_ra>
